<compile_context>
chip_gen: v6e
topology: v6e:2x2x1
jax: 0.10.0
libtpu: 0.0.40
codegen_flags: <defaults>
</compile_context>

<pallas_src>
import jax
import jax.numpy as jnp
from jax import lax
from jax.experimental import pallas as pl
from jax.experimental.pallas import tpu as pltpu


def siamese_kernel(tok_ref, g_ref, b_ref, out_ref):
    # tok_ref: (tb, 2*L) int32  token ids; columns [0:L] = sentence 1, [L:2L] = sentence 2
    # g_ref  : (Vp, H)  bf16    fused table G = Embedding @ Linear.weight.T (rows >= V are 0)
    # b_ref  : (1, H)   f32     Linear bias
    # out_ref: (1, tb)  f32     cosine distance per batch row (lane-dense)
    tb, twoL = tok_ref.shape
    Vp, H = g_ref.shape
    L = twoL // 2
    M = tb * twoL

    tok = tok_ref[...]                                                 # (tb, 2L)

    # One-hot gather (exact): lane-axis iota compare, then a single bf16 MXU matmul
    # against the fused table G.
    iota = lax.broadcasted_iota(jnp.int32, (tb, twoL, Vp), 2)
    onehot = (tok[:, :, None] == iota).astype(jnp.bfloat16)           # (tb, 2L, Vp)
    y = jnp.dot(onehot.reshape(M, Vp), g_ref[...],
                preferred_element_type=jnp.float32)                   # (M, H) f32

    # Max-pool over the sequence; bias added after the max (exactly equivalent since
    # the bias is constant along the sequence axis).
    v = jnp.max(y.reshape(tb, 2, L, H), axis=2) + b_ref[...][None]    # (tb, 2, H)
    v1 = v[:, 0, :]                                                    # (tb, H)
    v2 = v[:, 1, :]

    # cosine distance: 1 - <v1,v2> / (max(||v1||, eps) * max(||v2||, eps))
    # rsqrt(max(sum(v*v), eps^2)) == 1 / max(||v||, eps)  -> matches F.normalize(eps=1e-12).
    eps = 1e-12
    dot12 = jnp.sum(v1 * v2, axis=-1, keepdims=True)                  # (tb, 1)
    inv1 = lax.rsqrt(jnp.maximum(jnp.sum(v1 * v1, axis=-1, keepdims=True), eps * eps))
    inv2 = lax.rsqrt(jnp.maximum(jnp.sum(v2 * v2, axis=-1, keepdims=True), eps * eps))
    dist = 1.0 - dot12 * inv1 * inv2                                   # (tb, 1)
    out_ref[...] = jnp.transpose(dist)                                 # (1, tb) lane-dense store


def siamese_forward(tokens1, tokens2, emb_table, w, b, *, batch_tile=None):
    """cos_loss branch with s2 given and target=None -> cosine distance, shape (B,)."""
    B, L = tokens1.shape
    V, H = emb_table.shape

    # Fuse Embedding and Linear once, outside the kernel:  G = emb @ W.T  (V, H).
    # Pad the vocab dim to a multiple of 128 with zero rows (exact: zero rows
    # contribute nothing to the one-hot matmul).
    g = emb_table.astype(jnp.float32) @ jnp.transpose(w).astype(jnp.float32)
    Vp = ((V + 127) // 128) * 128
    g = jnp.pad(g, ((0, Vp - V), (0, 0))).astype(jnp.bfloat16)
    b2 = b.reshape(1, H).astype(jnp.float32)

    # Flat token slab: columns [0:L] = s1, [L:2L] = s2.  Note: ids outside [0, V)
    # would silently gather a zero row (PyTorch Embedding would error) - keep ids in range.
    tok = jnp.concatenate([tokens1, tokens2], axis=1).astype(jnp.int32)   # (B, 2L)

    # Batch tile: large enough to amortize per-step overhead, lane-aligned so the
    # (1, tb) output block is unmasked, and >=2 tiles for big batches so the
    # "parallel" grid axis can shard across both TensorCores on v7x.  Per-tile VMEM
    # (one-hot (tb*2L, Vp) bf16 + (tb*2L, H) f32 result, double buffered) stays well
    # under the 32 MiB scoped limit on every generation.
    if batch_tile is not None:
        tb = batch_tile
    elif B % 256 == 0 and B >= 512:
        tb = 256
    elif B % 128 == 0 and B >= 256:
        tb = 128
    else:
        tb = B                     # small batch: one resident tile
    assert B % tb == 0, "batch must be divisible by the batch tile"
    grid = (B // tb,)

    out = pl.pallas_call(
        siamese_kernel,
        out_shape=jax.ShapeDtypeStruct((1, B), jnp.float32),
        grid_spec=pltpu.PrefetchScalarGridSpec(
            num_scalar_prefetch=0,
            grid=grid,
            in_specs=[
                pl.BlockSpec((tb, 2 * L), lambda i: (i, 0)),   # tokens, tiled over batch
                pl.BlockSpec((Vp, H), lambda i: (0, 0)),       # fused table G (resident)
                pl.BlockSpec((1, H), lambda i: (0, 0)),        # bias (resident)
            ],
            out_specs=pl.BlockSpec((1, tb), lambda i: (0, i)),  # lane-dense output slab
        ),
        compiler_params=pltpu.CompilerParams(
            dimension_semantics=("parallel",),         # shards batch tiles across TCs (v7x)
            vmem_limit_bytes=32 * 1024 * 1024,         # safe on v5e/v6e (128 MiB) and v7x (64 MiB)
        ),
    )(tok, g, b2)
    return out[0]


def reference_forward(tokens1, tokens2, emb_table, w, b):
    """Pure-JAX f32 reference mirroring the PyTorch forward."""
    def encode(tok):
        e = jnp.take(emb_table, tok, axis=0)
        y = jnp.einsum("blh,oh->blo", e, w) + b[None, None, :]
        return jnp.max(y, axis=1)

    def norm(x):
        return x / jnp.maximum(jnp.linalg.norm(x, axis=-1, keepdims=True), 1e-12)

    v1, v2 = encode(tokens1), encode(tokens2)
    return 1.0 - jnp.sum(norm(v1) * norm(v2), axis=-1)


def reference_forward_bf16_table(tokens1, tokens2, emb_table, w, b):
    """Reference with the kernel's bf16-rounded fused table (tight-tolerance check)."""
    g = (emb_table.astype(jnp.float32) @ jnp.transpose(w).astype(jnp.float32))
    g = g.astype(jnp.bfloat16).astype(jnp.float32)

    def encode(tok):
        y = jnp.take(g, tok, axis=0)            # (B, L, H)
        return jnp.max(y, axis=1) + b[None, :]

    def norm(x):
        return x / jnp.maximum(jnp.linalg.norm(x, axis=-1, keepdims=True), 1e-12)

    v1, v2 = encode(tokens1), encode(tokens2)
    return 1.0 - jnp.sum(norm(v1) * norm(v2), axis=-1)


if __name__ == "__main__":
    # config: hidden_size=32, vocab_size=30 (+1 padding row), max_length=8, batch=2
    B, L, H, VOCAB = 2, 8, 32, 30

    key = jax.random.PRNGKey(0)
    k_emb, k_w, k_b, k_t1, k_t2 = jax.random.split(key, 5)

    emb_table = jax.random.normal(k_emb, (VOCAB + 1, H), jnp.float32) * 0.1
    emb_table = emb_table.at[0].set(0.0)                       # padding_idx=0 row is zero
    w = jax.random.normal(k_w, (H, H), jnp.float32) * 0.1      # nn.Linear weight [out, in]
    b = jax.random.normal(k_b, (H,), jnp.float32) * 0.1

    tokens1 = jax.random.randint(k_t1, (B, L), 0, VOCAB + 1, jnp.int32)
    tokens2 = jax.random.randint(k_t2, (B, L), 0, VOCAB + 1, jnp.int32)

    out = jax.block_until_ready(siamese_forward(tokens1, tokens2, emb_table, w, b))
    assert out.shape == (B,)

    # Tight check against a reference that uses the same bf16-rounded fused table.
    ref_bf16 = reference_forward_bf16_table(tokens1, tokens2, emb_table, w, b)
    assert jnp.allclose(out, ref_bf16, atol=1e-4, rtol=1e-4), (out, ref_bf16)

    # Loose check against the pure-f32 reference (bf16 table quantization ~0.4% relative).
    ref = reference_forward(tokens1, tokens2, emb_table, w, b)
    assert jnp.allclose(out, ref, atol=2e-2, rtol=2e-2), (out, ref)

    # TODO(synk): loss branches (CosineEmbeddingLoss / triplet boolean-mask mean) involve
    # data-dependent batch masking and are left to plain JAX; nn.Dropout is defined in the
    # module but never applied in SentenceEncoder.forward, so it is intentionally omitted.
    print("KERNEL_OK")
</pallas_src>

<mosaic_0001>
module attributes {stable_mosaic.version = 11 : i64} {
  func.func @siamese_kernel(%arg0: i32, %arg1: memref<2x16xi32, #tpu.memory_space<vmem>>, %arg2: memref<128x32xbf16, #tpu.memory_space<vmem>>, %arg3: memref<1x32xf32, #tpu.memory_space<vmem>>, %arg4: memref<1x2xf32, #tpu.memory_space<vmem>>) attributes {dimension_semantics = [#tpu.dimension_semantics<parallel>], iteration_bounds = array<i64: 1>, scalar_prefetch = 0 : i64, scratch_operands = 0 : i64, tpu.core_type = #tpu.core_type<tc>, window_params = [{transform_indices = @transform_0, window_bounds = array<i64: 2, 16>}, {pipeline_mode = #tpu.pipeline_mode<synchronous>, transform_indices = @transform_1, window_bounds = array<i64: 128, 32>}, {pipeline_mode = #tpu.pipeline_mode<synchronous>, transform_indices = @transform_2, window_bounds = array<i64: 1, 32>}, {transform_indices = @transform_3, window_bounds = array<i64: 1, 2>}]} {
    %c0 = arith.constant 0 : index
    %c0_0 = arith.constant 0 : index
    %0 = vector.load %arg1[%c0, %c0_0] : memref<2x16xi32, #tpu.memory_space<vmem>>, vector<2x16xi32>
    %1 = tpu.iota {dimensions = array<i32: 2>} : vector<2x16x128xi32>
    %2 = vector.shape_cast %0 : vector<2x16xi32> to vector<2x16x1xi32>
    %3 = vector.broadcast %2 : vector<2x16x1xi32> to vector<2x16x128xi32>
    %4 = arith.cmpi eq, %3, %1 : vector<2x16x128xi32>
    %5 = arith.extui %4 : vector<2x16x128xi1> to vector<2x16x128xi32>
    %6 = arith.sitofp %5 : vector<2x16x128xi32> to vector<2x16x128xf32>
    %7 = arith.truncf %6 : vector<2x16x128xf32> to vector<2x16x128xbf16>
    %8 = vector.shape_cast %7 : vector<2x16x128xbf16> to vector<32x128xbf16>
    %c0_1 = arith.constant 0 : index
    %c0_2 = arith.constant 0 : index
    %9 = vector.load %arg2[%c0_1, %c0_2] : memref<128x32xbf16, #tpu.memory_space<vmem>>, vector<128x32xbf16>
    %cst = arith.constant dense<0.000000e+00> : vector<32x32xf32>
    %10 = tpu.matmul %8, %9, %cst {dimension_numbers = #tpu.dot_dimension_numbers<[1], [0], [0], [1], [0, 0, 1, 1], [], []>} : vector<32x128xbf16>, vector<128x32xbf16>, vector<32x32xf32> -> vector<32x32xf32>
    %11 = vector.shape_cast %10 : vector<32x32xf32> to vector<2x2x8x32xf32>
    %cst_3 = arith.constant dense<0xFF800000> : vector<2x2x32xf32>
    %12 = vector.multi_reduction <maximumf>, %11, %cst_3 [2] : vector<2x2x8x32xf32> to vector<2x2x32xf32>
    %c0_4 = arith.constant 0 : index
    %c0_5 = arith.constant 0 : index
    %13 = vector.load %arg3[%c0_4, %c0_5] : memref<1x32xf32, #tpu.memory_space<vmem>>, vector<1x32xf32>
    %14 = vector.shape_cast %13 : vector<1x32xf32> to vector<1x1x32xf32>
    %15 = vector.broadcast %14 : vector<1x1x32xf32> to vector<2x2x32xf32>
    %16 = arith.addf %12, %15 : vector<2x2x32xf32>
    %17 = vector.extract_strided_slice %16 {offsets = [0, 0, 0], sizes = [2, 1, 32], strides = [1, 1, 1]} : vector<2x2x32xf32> to vector<2x1x32xf32>
    %18 = vector.shape_cast %17 : vector<2x1x32xf32> to vector<2x32xf32>
    %19 = vector.extract_strided_slice %16 {offsets = [0, 1, 0], sizes = [2, 1, 32], strides = [1, 1, 1]} : vector<2x2x32xf32> to vector<2x1x32xf32>
    %20 = vector.shape_cast %19 : vector<2x1x32xf32> to vector<2x32xf32>
    %21 = arith.mulf %18, %20 : vector<2x32xf32>
    %cst_6 = arith.constant dense<0.000000e+00> : vector<2xf32>
    %22 = vector.multi_reduction <add>, %21, %cst_6 [1] : vector<2x32xf32> to vector<2xf32>
    %23 = vector.shape_cast %22 : vector<2xf32> to vector<2x1xf32>
    %24 = arith.mulf %18, %18 : vector<2x32xf32>
    %cst_7 = arith.constant dense<0.000000e+00> : vector<2xf32>
    %25 = vector.multi_reduction <add>, %24, %cst_7 [1] : vector<2x32xf32> to vector<2xf32>
    %26 = vector.shape_cast %25 : vector<2xf32> to vector<2x1xf32>
    %cst_8 = arith.constant 1.000000e-24 : f32
    %27 = vector.broadcast %cst_8 : f32 to vector<2x1xf32>
    %28 = arith.maximumf %26, %27 : vector<2x1xf32>
    %29 = math.rsqrt %28 : vector<2x1xf32>
    %30 = arith.mulf %20, %20 : vector<2x32xf32>
    %cst_9 = arith.constant dense<0.000000e+00> : vector<2xf32>
    %31 = vector.multi_reduction <add>, %30, %cst_9 [1] : vector<2x32xf32> to vector<2xf32>
    %32 = vector.shape_cast %31 : vector<2xf32> to vector<2x1xf32>
    %cst_10 = arith.constant 1.000000e-24 : f32
    %33 = vector.broadcast %cst_10 : f32 to vector<2x1xf32>
    %34 = arith.maximumf %32, %33 : vector<2x1xf32>
    %35 = math.rsqrt %34 : vector<2x1xf32>
    %36 = arith.mulf %23, %29 : vector<2x1xf32>
    %37 = arith.mulf %36, %35 : vector<2x1xf32>
    %cst_11 = arith.constant 1.000000e+00 : f32
    %38 = vector.broadcast %cst_11 : f32 to vector<2x1xf32>
    %39 = arith.subf %38, %37 : vector<2x1xf32>
    %40 = tpu.transpose %39, [1, 0] : vector<2x1xf32> -> vector<1x2xf32>
    %c0_12 = arith.constant 0 : index
    %c0_13 = arith.constant 0 : index
    %41 = vector.load %arg4[%c0_12, %c0_13] : memref<1x2xf32, #tpu.memory_space<vmem>>, vector<1x2xf32>
    tpu.vector_store %arg4[%c0_12, %c0_13], %40 {strides = array<i32>} : memref<1x2xf32, #tpu.memory_space<vmem>>, vector<1x2xf32>,
    return
  }
  func.func @transform_0(%arg0: i32) -> (i32, i32) {
    %c0_i32 = arith.constant 0 : i32
    %c0_i32_0 = arith.constant 0 : i32
    return %arg0, %c0_i32 : i32, i32
  }
  func.func @transform_1(%arg0: i32) -> (i32, i32) {
    %c0_i32 = arith.constant 0 : i32
    %c0_i32_0 = arith.constant 0 : i32
    %c0_i32_1 = arith.constant 0 : i32
    return %c0_i32, %c0_i32_0 : i32, i32
  }
  func.func @transform_2(%arg0: i32) -> (i32, i32) {
    %c0_i32 = arith.constant 0 : i32
    %c0_i32_0 = arith.constant 0 : i32
    %c0_i32_1 = arith.constant 0 : i32
    return %c0_i32, %c0_i32_0 : i32, i32
  }
  func.func @transform_3(%arg0: i32) -> (i32, i32) {
    %c0_i32 = arith.constant 0 : i32
    %c0_i32_0 = arith.constant 0 : i32
    return %c0_i32, %arg0 : i32, i32
  }
}

</mosaic_0001>

<bundles_post_ra>
// kernel: tpu_custom_call.1
= control target key start
LH: loop header
LB: loop body
LE: loop exit
PB: predicated region body
PF: predicated region fallthrough
CT: control target
= control target key end

     0   :  { %v17_v0 = vlaneseq  ;;  %s440_s0 = inlined_call_operand.vmem [shape: s32[2,16], index: 0, kind: input, shape index: {}]   ;;  %s441_s1 = inlined_call_operand.vmem [shape: bf16[128,32], index: 1, kind: input, shape index: {}]   ;;  %s442_s2 = inlined_call_operand.vmem [shape: f32[1,32], index: 2, kind: input, shape index: {}]   ;;  %s443_s3 = inlined_call_operand.hbm [shape: f32[1,2], index: 3, kind: output, shape index: {}]  }
   0x1   :  { %v345_v1 = vld [vmem:[%s441_s1 + $0x38] sm:$0xff]   ;;  %v346_v3 = vld [vmem:[%s441_s1 + $0x30] sm:$0xff]   ;;  %v16_v4 = vld [vmem:[%s440_s0] sm:$0x3] }
   0x2   :  { %v20_v2 = vshrl.u32 %v17_v0, 7  ;;  %322 = vmatprep.subr.bf16.mxu0 %v345_v1  ;;  %v347_v9 = vld [vmem:[%s441_s1 + $0x28] sm:$0xff]  }
   0x3   :  { %323 = vmatpush3.bf16.msra.mxu0 %v345_v1 }
   0x4   :  { %v32_v5 = vsub.s32 1, %v20_v2  ;;  %v21_v6 = vsub.s32 0, %v20_v2  ;;  %324 = vmatprep.subr.bf16.mxu0 %v346_v3 }
   0x6   :  { %v33_v7 = vrot.slane %v16_v4, %v32_v5  ;;  %v22_v8 = vrot.slane %v16_v4, %v21_v6 }
   0x7   :  { %325 = vmatpush3.bf16.msra.mxu0 %v346_v3 }
   0x8   :  { %35 = vbcast.lane.b32.xlu1 %v33_v7, 256  ;;  %24 = vbcast.lane.b32.xlu0 %v22_v8, 256 }
   0x9   :  { %8 = vsyncpa [#allocation3], 0  ;;  %326 = vmatprep.subr.bf16.mxu0 %v347_v9  ;;  %v348_v10 = vld [vmem:[%s441_s1 + $0x20] sm:$0xff]   ;;  %v349_v11 = vld [vmem:[%s441_s1 + $0x18] sm:$0xff]   ;;  %v18_v17 = vand.u32 127, %v17_v0  ;;  %vm168_vm6 = vcmask 261120  }
   0xa   :  { %v350_v12 = vld [vmem:[%s441_s1 + $0x10] sm:$0xff]   ;;  %v351_v13 = vld [vmem:[%s441_s1 + $0x8] sm:$0xff]   ;;  %v352_v14 = vld [vmem:[%s441_s1] sm:$0xff]   ;;  %v379_v20 = vmov 1.0|1.0   ;;  %vm213_vm7 = vcmask 1041409  }
   0xb   :  { %327 = vmatpush3.bf16.msra.mxu0 %v347_v9  ;;  %v311_v43 = vld [vmem:[%s442_s2] ss:$0 sm:$0xff]  ;;  %vm216_vm8 = vcmask 254976   ;;  %s380_s2 = smov [#allocation2]   ;;  %vm279_vm9 = vcmask 8192  }
   0xc   :  { %39 = vbcast.lane.b32.xlu1 %v33_v7, 264  ;;  %28 = vbcast.lane.b32.xlu0 %v22_v8, 264  ;;  %s287_s30 = sshll.u32 %s380_s2, 4  ;;  %s288_s30 = int_to_ptr.vmem [resolvable:$true] %s287_s30 }
   0xd   :  { %328 = vmatprep.subr.bf16.mxu0 %v348_v10  ;;  %s357_s4 = scalar_lea.vmem %s288_s30, 16  ;;  %s361_s5 = scalar_lea.vmem %s288_s30, 32 }
   0xe   :  { %p358_p0 = scmp.ne.s32.totalorder %s288_s30, %s357_s4  ;;  %p362_p1 = scmp.lt.s32.totalorder %s288_s30, %s288_s30 }
   0xf   :  { %329 = vmatpush3.bf16.msra.mxu0 %v348_v10  ;;  %p363_p2 = scmp.lt.s32.totalorder %s361_s5, %s357_s4 }
  0x10   :  { %330 = vmatprep.subr.bf16.mxu0 %v349_v11 }
  0x11   :  { %p364_p3 = por %p363_p2, %p362_p1 }
  0x13   :  { %331 = vmatpush3.bf16.msra.mxu0 %v349_v11  ;;  %p365_p4 = pnand %p364_p3, %p358_p0 }
  0x14   :  { %332 = vmatprep.subr.bf16.mxu0 %v350_v12 }
  0x17   :  { %333 = vmatpush3.bf16.msra.mxu0 %v350_v12 }
  0x18   :  { %334 = vmatprep.subr.bf16.mxu0 %v351_v13 }
  0x1b   :  { %335 = vmatpush3.bf16.msra.mxu0 %v351_v13 }
  0x1c   :  { %336 = vmatprep.subr.bf16.mxu0 %v352_v14 }
  0x1f   :  { %337 = vmatpush3.bf16.msra.mxu0 %v352_v14 }
  0x7a   :  { %v36_v15 = vpop.permute.xlu1 %35  ;;  %v25_v16 = vpop.permute.xlu0 %24 }
  0x7b   :  { %vm43_vm0 = vcmp.eq.s32.totalorder %v36_v15, %v18_v17  ;;  %vm41_vm3 = vcmp.eq.s32.totalorder %v25_v16, %v18_v17 }
  0x7e   :  { %v40_v18 = vpop.permute.xlu1 %39  ;;  %v29_v19 = vpop.permute.xlu0 %28 }
  0x7f   :  { %vm44_vm1 = vcmp.eq.s32.totalorder %v40_v18, %v18_v17  ;;  %vm42_vm2 = vcmp.eq.s32.totalorder %v29_v19, %v18_v17 }
  0x80   :  { %vm309_vm4 = vmpackc.low %vm44_vm1, %vm43_vm0 }
  0x81   :  { %vm307_vm5 = vmpackc.low %vm42_vm2, %vm41_vm3 }
  0x82   :  { %338 = vmatprep.mubr.msk.bf16.mxu0 %vm307_vm5, %v379_v20 }
  0x83   :  { %339 = vmatmul.mubr.msk.bf16.vlgmr.msra.gmra.mxu0 %vm309_vm4, %v379_v20 }
 0x143   :  { %v340_v21 = vpop.f32.mrf.mxu0 }
 0x144   :  { %v183_v22 = vsel %vm168_vm6, %v340_v21, -inf }
 0x145   :  { %v184_v23 = vrot.slane %v183_v22, 4  ;;  %v153_v24 = vpop.f32.mrf.mxu0 }
 0x146   :  { %v169_v25 = vsel %vm168_vm6, %v153_v24, -inf }
 0x147   :  { %v185_v26 = vmax.f32 %v183_v22, %v184_v23  ;;  %v170_v27 = vrot.slane %v169_v25, 4  ;;  %v341_v28 = vpop.f32.mrf.mxu0 }
 0x148   :  { %v190_v29 = vsel %vm168_vm6, %v341_v28, -inf }
 0x149   :  { %v186_v30 = vrot.slane %v185_v26, 2  ;;  %v171_v31 = vmax.f32 %v169_v25, %v170_v27  ;;  %v191_v32 = vrot.slane %v190_v29, 4  ;;  %v156_v33 = vpop.f32.mrf.mxu0 }
 0x14a   :  { %v176_v34 = vsel %vm168_vm6, %v156_v33, -inf }
 0x14b   :  { %v187_v35 = vmax.f32 %v185_v26, %v186_v30  ;;  %v172_v36 = vrot.slane %v171_v31, 2  ;;  %v192_v37 = vmax.f32 %v190_v29, %v191_v32  ;;  %v177_v38 = vrot.slane %v176_v34, 4 }
 0x14d   :  { %v188_v39 = vrot.slane %v187_v35, 1  ;;  %v173_v40 = vmax.f32 %v171_v31, %v172_v36  ;;  %v193_v41 = vrot.slane %v192_v37, 2  ;;  %v178_v42 = vmax.f32 %v176_v34, %v177_v38 }
 0x14f   :  { %v189_v44 = vmax.f32 %v187_v35, %v188_v39  ;;  %v174_v45 = vrot.slane %v173_v40, 1  ;;  %v194_v46 = vmax.f32 %v192_v37, %v193_v41  ;;  %v179_v47 = vrot.slane %v178_v42, 2 }
 0x151   :  { %v206_v48 = vadd.f32 %v311_v43, %v189_v44  ;;  %v175_v49 = vmax.f32 %v173_v40, %v174_v45  ;;  %v195_v50 = vrot.slane %v194_v46, 1  ;;  %v180_v51 = vmax.f32 %v178_v42, %v179_v47 }
 0x153   :  { %v204_v52 = vadd.f32 %v311_v43, %v175_v49  ;;  %v196_v53 = vmax.f32 %v194_v46, %v195_v50  ;;  %v181_v54 = vrot.slane %v180_v51, 1  ;;  %v221_v55 = vmul.f32 %v206_v48, %v206_v48 }
 0x155   :  { %v207_v56 = vadd.f32 %v311_v43, %v196_v53  ;;  %v182_v57 = vmax.f32 %v180_v51, %v181_v54  ;;  %v220_v58 = vmul.f32 %v204_v52, %v204_v52  ;;  %v224_v59 = vrot.slane %v221_v55, 7 }
 0x157   :  { %v205_v60 = vadd.f32 %v311_v43, %v182_v57  ;;  %v225_v61 = vsel %vm213_vm7, %v224_v59, %v220_v58  ;;  %v233_v62 = vmul.f32 %v207_v56, %v207_v56  ;;  %v209_v63 = vmul.f32 %v207_v56, %v206_v48 }
 0x158   :  { %v227_v0 = vsel %vm216_vm8, %v225_v61, 0.0 }
 0x159   :  { %228 = vadd.xlane.f32.xlu0 %v227_v0  ;;  %v232_v1 = vmul.f32 %v205_v60, %v205_v60  ;;  %v236_v2 = vrot.slane %v233_v62, 7  ;;  %v208_v3 = vmul.f32 %v205_v60, %v204_v52  ;;  %v212_v4 = vrot.slane %v209_v63, 7 }
 0x15b   :  { %v237_v5 = vsel %vm213_vm7, %v236_v2, %v232_v1  ;;  %v214_v6 = vsel %vm213_vm7, %v212_v4, %v208_v3 }
 0x15c   :  { %v239_v7 = vsel %vm216_vm8, %v237_v5, 0.0  ;;  %v217_v8 = vsel %vm216_vm8, %v214_v6, 0.0 }
 0x15d   :  { %240 = vadd.xlane.f32.xlu1 %v239_v7  ;;  %218 = vadd.xlane.f32.xlu0 %v217_v8 }
 0x1e2   :  { %v229_v9 = vpop.xlane.xlu0 %228 }
 0x1e3   :  { %v230_v10 = vmax.f32 %v229_v9, 1e-24 }
 0x1e5   :  { %353 = vrsqrt.f32 %v230_v10 }
 0x1e6   :  { %v241_v11 = vpop.xlane.xlu1 %240  ;;  %v219_v14 = vpop.xlane.xlu0 %218 }
 0x1e7   :  { %v242_v12 = vmax.f32 %v241_v11, 1e-24 }
 0x1e9   :  { %355 = vrsqrt.f32 %v242_v12 }
 0x1f2   :  { %v354_v13 = vpop.eup %353 }
 0x1f3   :  { %v244_v15 = vmul.f32 %v354_v13, %v219_v14 }
 0x1f6   :  { %v356_v16 = vpop.eup %355 }
 0x1f7   :  { %v245_v17 = vmul.f32 %v356_v16, %v244_v15 }
 0x1f9   :  { %v246_v18 = vsub.f32 1.0, %v245_v17 }
 0x1fb   :  { %247 = vxpose.xlu0.b32.start.end [1/1] (short) (narrow) %v246_v18, 8 }
 0x277   :  { %v263_v19 = vpop.trf.xlu0 }
 0x278   :  { %280 = vst.msk [vmem:[#allocation2] sm:$0x1] %vm279_vm9, %v263_v19 }
 0x279   :  { %368 = shalt.err (!%p365_p4)
}
 0x27a   :  { %290 = dma.vmem_to_hbm [thread:$0]  %s288_s30, 16, %s443_s3, [#allocation3]  }
 0x27b   :  { %377 = dma.done.wait [#allocation3], 16  }
 0x27c   :  { %378 = vsyncadd [#allocation3], 4294967280 }
 0x27d   :  { %294 = vsyncpa [#allocation3], 1 }

</bundles_post_ra>
